<compile_context>
chip_gen: v5e
topology: v5e:2x2
jax: 0.10.0
libtpu: 0.0.40
codegen_flags: <defaults>
</compile_context>

<pallas_src>
import jax
import jax.numpy as jnp
from jax import lax
from jax.experimental import pallas as pl
from jax.experimental.pallas import tpu as pltpu


def gru_encoder_kernel(ids_ref,   # SMEM scalar prefetch: (T,) token ids
                       emb_ref,   # (V, H)    embedding table, resident in VMEM
                       h0_ref,    # (1, H)    initial hidden state
                       w_ref,     # (2H, 4H)  packed [W_ih^T ; W_hh^T], column blocks [r, z, i_n, h_n]
                       b_ref,     # (1, 4H)   packed biases [b_r(sum), b_z(sum), b_in, b_hn]
                       out_ref,   # (T, H)    per-step outputs
                       hout_ref): # (1, H)    final hidden state
    H = h0_ref.shape[-1]
    T = out_ref.shape[0]

    # Hoisted once: weights/bias live in vregs for the whole sequence.
    w_x = w_ref[:H, :]      # x-projection rows  -> columns (i_r, i_z, i_n, 0)
    w_h = w_ref[H:, :]      # h-projection rows  -> columns (h_r, h_z, 0, h_n)
    b = b_ref[...]

    def step(t, h_prev):
        tok = ids_ref[t]
        x = emb_ref[pl.ds(tok, 1), :]                                   # (1, H) row gather in VMEM
        g = (jnp.dot(x, w_x, preferred_element_type=jnp.float32)
             + jnp.dot(h_prev, w_h, preferred_element_type=jnp.float32)
             + b)                                                       # (1, 4H)
        r = jax.nn.sigmoid(g[:, 0:H])
        z = jax.nn.sigmoid(g[:, H:2 * H])
        n = jnp.tanh(g[:, 2 * H:3 * H] + r * g[:, 3 * H:4 * H])
        h_new = (1.0 - z) * n + z * h_prev
        out_ref[pl.ds(t, 1), :] = h_new
        return h_new

    h_final = lax.fori_loop(0, T, step, h0_ref[...], unroll=True)
    hout_ref[...] = h_final


def pack_gru_params(w_ih, w_hh, b_ih, b_hh, dtype=jnp.float32):
    """Pack PyTorch-layout GRU params (weights (3H, H), biases (3H,), gate order r,z,n)
    into one (2H, 4H) RHS and one (1, 4H) bias whose column blocks are [r, z, i_n, h_n]."""
    H = w_ih.shape[1]
    w_ih_t = w_ih.T.astype(dtype)          # (H, 3H)
    w_hh_t = w_hh.T.astype(dtype)          # (H, 3H)
    zeros = jnp.zeros((H, H), dtype=dtype)
    top = jnp.concatenate([w_ih_t[:, :2 * H], w_ih_t[:, 2 * H:], zeros], axis=1)   # x rows
    bot = jnp.concatenate([w_hh_t[:, :2 * H], zeros, w_hh_t[:, 2 * H:]], axis=1)   # h rows
    w_packed = jnp.concatenate([top, bot], axis=0)                                  # (2H, 4H)
    b_packed = jnp.concatenate(
        [b_ih[:2 * H] + b_hh[:2 * H], b_ih[2 * H:], b_hh[2 * H:]]
    ).astype(dtype).reshape(1, 4 * H)                                                # (1, 4H)
    return w_packed, b_packed


@jax.jit
def encoder_forward(token_ids, hidden, emb, w_packed, b_packed):
    """token_ids: (T,) int32; hidden: (1, 1, H).
    Returns (outputs (T, 1, H), final hidden (1, 1, H)); T == 1 matches Encoder.forward."""
    V, H = emb.shape
    T = token_ids.shape[0]

    ids = jnp.clip(token_ids.astype(jnp.int32), 0, V - 1)   # guard against OOB embedding reads
    h0 = hidden.reshape(1, H).astype(jnp.float32)

    grid_spec = pltpu.PrefetchScalarGridSpec(
        num_scalar_prefetch=1,
        grid=(1,),                                   # single invocation; T loops in-kernel
        in_specs=[
            pl.BlockSpec((V, H), lambda i, ids: (0, 0)),            # whole table resident in VMEM
            pl.BlockSpec((1, H), lambda i, ids: (0, 0)),
            pl.BlockSpec((2 * H, 4 * H), lambda i, ids: (0, 0)),    # packed weights resident
            pl.BlockSpec((1, 4 * H), lambda i, ids: (0, 0)),        # packed bias resident
        ],
        out_specs=[
            pl.BlockSpec((T, H), lambda i, ids: (0, 0)),            # one dense writeback slab
            pl.BlockSpec((1, H), lambda i, ids: (0, 0)),
        ],
    )

    outputs, h_final = pl.pallas_call(
        gru_encoder_kernel,
        out_shape=(jax.ShapeDtypeStruct((T, H), jnp.float32),
                   jax.ShapeDtypeStruct((1, H), jnp.float32)),
        grid_spec=grid_spec,
        compiler_params=pltpu.CompilerParams(
            dimension_semantics=("arbitrary",)),
    )(ids, emb.astype(jnp.float32), h0, w_packed, b_packed)

    return outputs.reshape(T, 1, H), h_final.reshape(1, 1, H)


def reference_forward(token_ids, hidden, emb, w_ih, w_hh, b_ih, b_hh):
    """Pure-JAX reference matching torch.nn.GRU semantics, stepped over the sequence."""
    H = hidden.shape[-1]
    h = hidden.reshape(1, H)
    outs = []
    for tok in token_ids:
        x = emb[tok][None, :]
        gi = x @ w_ih.T + b_ih[None, :]
        gh = h @ w_hh.T + b_hh[None, :]
        i_r, i_z, i_n = gi[:, :H], gi[:, H:2 * H], gi[:, 2 * H:]
        h_r, h_z, h_n = gh[:, :H], gh[:, H:2 * H], gh[:, 2 * H:]
        r = jax.nn.sigmoid(i_r + h_r)
        z = jax.nn.sigmoid(i_z + h_z)
        n = jnp.tanh(i_n + r * h_n)
        h = (1.0 - z) * n + z * h
        outs.append(h)
    return jnp.stack(outs, axis=0), h.reshape(1, 1, H)


if __name__ == "__main__":
    V = 10    # inputSize (vocab)
    H = 32    # hiddenSize
    T = 8     # demo sequence length (T == 1 reproduces Encoder.forward exactly)

    key = jax.random.PRNGKey(0)
    k_emb, k_wih, k_whh, k_bih, k_bhh, k_tok = jax.random.split(key, 6)

    emb = jax.random.normal(k_emb, (V, H), dtype=jnp.float32)
    bound = 1.0 / jnp.sqrt(H)
    # PyTorch nn.GRU layout: weight_ih_l0 / weight_hh_l0 are (3H, H), gate order (r, z, n).
    w_ih = jax.random.uniform(k_wih, (3 * H, H), minval=-bound, maxval=bound, dtype=jnp.float32)
    w_hh = jax.random.uniform(k_whh, (3 * H, H), minval=-bound, maxval=bound, dtype=jnp.float32)
    b_ih = jax.random.uniform(k_bih, (3 * H,), minval=-bound, maxval=bound, dtype=jnp.float32)
    b_hh = jax.random.uniform(k_bhh, (3 * H,), minval=-bound, maxval=bound, dtype=jnp.float32)

    # Pack once; amortized over every forward call.  Kept f32: at H=32 the kernel is
    # overhead-bound, so a bf16 weight cast only adds VPU converts (gate on H if scaled up).
    w_packed, b_packed = pack_gru_params(w_ih, w_hh, b_ih, b_hh)

    hidden0 = jnp.zeros((1, 1, H), dtype=jnp.float32)     # Encoder.initHidden()

    # --- Single-token step: exactly Encoder.forward(input, hidden) ---
    token_id = jnp.array([3], dtype=jnp.int32)
    out1, hid1 = encoder_forward(token_id, hidden0, emb, w_packed, b_packed)
    out1 = jax.block_until_ready(out1)
    hid1 = jax.block_until_ready(hid1)
    ref_out1, ref_hid1 = reference_forward(token_id, hidden0, emb, w_ih, w_hh, b_ih, b_hh)
    assert out1.shape == (1, 1, H) and hid1.shape == (1, 1, H)
    assert jnp.allclose(out1, ref_out1, atol=1e-5), "single-step output mismatch"
    assert jnp.allclose(hid1, ref_hid1, atol=1e-5), "single-step hidden mismatch"

    # --- Whole sequence in one kernel invocation (weights resident, hidden carried in vregs) ---
    token_ids = jax.random.randint(k_tok, (T,), 0, V, dtype=jnp.int32)
    outs, hid = encoder_forward(token_ids, hidden0, emb, w_packed, b_packed)
    outs = jax.block_until_ready(outs)
    hid = jax.block_until_ready(hid)
    ref_outs, ref_hid = reference_forward(token_ids, hidden0, emb, w_ih, w_hh, b_ih, b_hh)
    assert outs.shape == (T, 1, H) and hid.shape == (1, 1, H)
    assert jnp.allclose(outs, ref_outs, atol=1e-5), "sequence outputs mismatch"
    assert jnp.allclose(hid, ref_hid, atol=1e-5), "sequence hidden mismatch"

    print("KERNEL_OK")
</pallas_src>

<mosaic_0001>
module attributes {stable_mosaic.version = 11 : i64} {
  func.func @gru_encoder_kernel(%arg0: i32, %arg1: memref<1xi32, #tpu.memory_space<smem>>, %arg2: memref<10x32xf32, #tpu.memory_space<vmem>>, %arg3: memref<1x32xf32, #tpu.memory_space<vmem>>, %arg4: memref<64x128xf32, #tpu.memory_space<vmem>>, %arg5: memref<1x128xf32, #tpu.memory_space<vmem>>, %arg6: memref<1x32xf32, #tpu.memory_space<vmem>>, %arg7: memref<1x32xf32, #tpu.memory_space<vmem>>) attributes {dimension_semantics = [#tpu.dimension_semantics<arbitrary>], iteration_bounds = array<i64: 1>, scalar_prefetch = 1 : i64, scratch_operands = 0 : i64, tpu.core_type = #tpu.core_type<tc>, window_params = [{pipeline_mode = #tpu.pipeline_mode<synchronous>, transform_indices = @transform_0, window_bounds = array<i64: 10, 32>}, {pipeline_mode = #tpu.pipeline_mode<synchronous>, transform_indices = @transform_1, window_bounds = array<i64: 1, 32>}, {pipeline_mode = #tpu.pipeline_mode<synchronous>, transform_indices = @transform_2, window_bounds = array<i64: 64, 128>}, {pipeline_mode = #tpu.pipeline_mode<synchronous>, transform_indices = @transform_3, window_bounds = array<i64: 1, 128>}, {pipeline_mode = #tpu.pipeline_mode<synchronous>, transform_indices = @transform_4, window_bounds = array<i64: 1, 32>}, {pipeline_mode = #tpu.pipeline_mode<synchronous>, transform_indices = @transform_5, window_bounds = array<i64: 1, 32>}]} {
    %c0 = arith.constant 0 : index
    %c0_0 = arith.constant 0 : index
    %0 = vector.load %arg4[%c0, %c0_0] : memref<64x128xf32, #tpu.memory_space<vmem>>, vector<32x128xf32>
    %c32 = arith.constant 32 : index
    %c0_1 = arith.constant 0 : index
    %1 = vector.load %arg4[%c32, %c0_1] : memref<64x128xf32, #tpu.memory_space<vmem>>, vector<32x128xf32>
    %c0_2 = arith.constant 0 : index
    %c0_3 = arith.constant 0 : index
    %2 = vector.load %arg5[%c0_2, %c0_3] : memref<1x128xf32, #tpu.memory_space<vmem>>, vector<1x128xf32>
    %c0_4 = arith.constant 0 : index
    %c0_5 = arith.constant 0 : index
    %3 = vector.load %arg3[%c0_4, %c0_5] : memref<1x32xf32, #tpu.memory_space<vmem>>, vector<1x32xf32>
    %c0_i32 = arith.constant 0 : i32
    %4 = arith.index_cast %c0_i32 : i32 to index
    %5 = memref.load %arg1[%4] : memref<1xi32, #tpu.memory_space<smem>>
    %6 = arith.index_cast %5 : i32 to index
    %c0_6 = arith.constant 0 : index
    %7 = vector.load %arg2[%6, %c0_6] : memref<10x32xf32, #tpu.memory_space<vmem>>, vector<1x32xf32>
    %cst = arith.constant dense<0.000000e+00> : vector<1x128xf32>
    %8 = tpu.matmul %7, %0, %cst {dimension_numbers = #tpu.dot_dimension_numbers<[1], [0], [0], [1], [0, 0, 1, 1], [], []>} : vector<1x32xf32>, vector<32x128xf32>, vector<1x128xf32> -> vector<1x128xf32>
    %cst_7 = arith.constant dense<0.000000e+00> : vector<1x128xf32>
    %9 = tpu.matmul %3, %1, %cst_7 {dimension_numbers = #tpu.dot_dimension_numbers<[1], [0], [0], [1], [0, 0, 1, 1], [], []>} : vector<1x32xf32>, vector<32x128xf32>, vector<1x128xf32> -> vector<1x128xf32>
    %10 = arith.addf %8, %9 : vector<1x128xf32>
    %11 = arith.addf %10, %2 : vector<1x128xf32>
    %12 = vector.extract_strided_slice %11 {offsets = [0, 0], sizes = [1, 32], strides = [1, 1]} : vector<1x128xf32> to vector<1x32xf32>
    %13 = arith.negf %12 : vector<1x32xf32>
    %14 = math.exp %13 : vector<1x32xf32>
    %cst_8 = arith.constant 1.000000e+00 : f32
    %15 = vector.broadcast %cst_8 : f32 to vector<1x32xf32>
    %16 = arith.addf %15, %14 : vector<1x32xf32>
    %17 = arith.divf %15, %16 : vector<1x32xf32>
    %18 = vector.extract_strided_slice %11 {offsets = [0, 32], sizes = [1, 32], strides = [1, 1]} : vector<1x128xf32> to vector<1x32xf32>
    %19 = arith.negf %18 : vector<1x32xf32>
    %20 = math.exp %19 : vector<1x32xf32>
    %cst_9 = arith.constant 1.000000e+00 : f32
    %21 = vector.broadcast %cst_9 : f32 to vector<1x32xf32>
    %22 = arith.addf %21, %20 : vector<1x32xf32>
    %23 = arith.divf %21, %22 : vector<1x32xf32>
    %24 = vector.extract_strided_slice %11 {offsets = [0, 64], sizes = [1, 32], strides = [1, 1]} : vector<1x128xf32> to vector<1x32xf32>
    %25 = vector.extract_strided_slice %11 {offsets = [0, 96], sizes = [1, 32], strides = [1, 1]} : vector<1x128xf32> to vector<1x32xf32>
    %26 = arith.mulf %17, %25 : vector<1x32xf32>
    %27 = arith.addf %24, %26 : vector<1x32xf32>
    %28 = math.tanh %27 : vector<1x32xf32>
    %cst_10 = arith.constant 1.000000e+00 : f32
    %29 = vector.broadcast %cst_10 : f32 to vector<1x32xf32>
    %30 = arith.subf %29, %23 : vector<1x32xf32>
    %31 = arith.mulf %30, %28 : vector<1x32xf32>
    %32 = arith.mulf %23, %3 : vector<1x32xf32>
    %33 = arith.addf %31, %32 : vector<1x32xf32>
    %34 = arith.index_cast %c0_i32 : i32 to index
    %c0_11 = arith.constant 0 : index
    %35 = vector.load %arg6[%34, %c0_11] : memref<1x32xf32, #tpu.memory_space<vmem>>, vector<1x32xf32>
    tpu.vector_store %arg6[%34, %c0_11], %33 {strides = array<i32>} : memref<1x32xf32, #tpu.memory_space<vmem>>, vector<1x32xf32>,
    %c1_i32 = arith.constant 1 : i32
    %c0_12 = arith.constant 0 : index
    %c0_13 = arith.constant 0 : index
    %36 = vector.load %arg7[%c0_12, %c0_13] : memref<1x32xf32, #tpu.memory_space<vmem>>, vector<1x32xf32>
    tpu.vector_store %arg7[%c0_12, %c0_13], %33 {strides = array<i32>} : memref<1x32xf32, #tpu.memory_space<vmem>>, vector<1x32xf32>,
    return
  }
  func.func @transform_0(%arg0: i32, %arg1: memref<1xi32, #tpu.memory_space<smem>>) -> (i32, i32) {
    %c0_i32 = arith.constant 0 : i32
    %c0_i32_0 = arith.constant 0 : i32
    %c0_i32_1 = arith.constant 0 : i32
    return %c0_i32, %c0_i32_0 : i32, i32
  }
  func.func @transform_1(%arg0: i32, %arg1: memref<1xi32, #tpu.memory_space<smem>>) -> (i32, i32) {
    %c0_i32 = arith.constant 0 : i32
    %c0_i32_0 = arith.constant 0 : i32
    %c0_i32_1 = arith.constant 0 : i32
    return %c0_i32, %c0_i32_0 : i32, i32
  }
  func.func @transform_2(%arg0: i32, %arg1: memref<1xi32, #tpu.memory_space<smem>>) -> (i32, i32) {
    %c0_i32 = arith.constant 0 : i32
    %c0_i32_0 = arith.constant 0 : i32
    %c0_i32_1 = arith.constant 0 : i32
    return %c0_i32, %c0_i32_0 : i32, i32
  }
  func.func @transform_3(%arg0: i32, %arg1: memref<1xi32, #tpu.memory_space<smem>>) -> (i32, i32) {
    %c0_i32 = arith.constant 0 : i32
    %c0_i32_0 = arith.constant 0 : i32
    %c0_i32_1 = arith.constant 0 : i32
    return %c0_i32, %c0_i32_0 : i32, i32
  }
  func.func @transform_4(%arg0: i32, %arg1: memref<1xi32, #tpu.memory_space<smem>>) -> (i32, i32) {
    %c0_i32 = arith.constant 0 : i32
    %c0_i32_0 = arith.constant 0 : i32
    %c0_i32_1 = arith.constant 0 : i32
    return %c0_i32, %c0_i32_0 : i32, i32
  }
  func.func @transform_5(%arg0: i32, %arg1: memref<1xi32, #tpu.memory_space<smem>>) -> (i32, i32) {
    %c0_i32 = arith.constant 0 : i32
    %c0_i32_0 = arith.constant 0 : i32
    %c0_i32_1 = arith.constant 0 : i32
    return %c0_i32, %c0_i32_0 : i32, i32
  }
}

</mosaic_0001>

<bundles_post_ra>
// kernel: encoder_forward.1
= control target key start
LH: loop header
LB: loop body
LE: loop exit
PB: predicated region body
PF: predicated region fallthrough
CT: control target
= control target key end

     0   :  { %13 = vsyncpa [#allocation5], 0  ;;  %s393_s0 = inlined_call_operand.<no memory space> [shape: s32[1], index: 0, kind: input, shape index: {}]   ;;  %s394_s1 = inlined_call_operand.hbm [shape: f32[10,32], index: 1, kind: input, shape index: {}]   ;;  %s395_s2 = inlined_call_operand.vmem [shape: f32[1,32], index: 2, kind: input, shape index: {}]   ;;  %s396_s3 = inlined_call_operand.hbm [shape: f32[64,128], index: 3, kind: input, shape index: {}]   ;;  %s397_s4 = inlined_call_operand.vmem [shape: f32[1,128], index: 4, kind: input, shape index: {}]   ;;  %s398_s5 = inlined_call_operand.hbm [shape: f32[1,32], index: 5, kind: output, shape index: {0}]   ;;  %s399_s6 = inlined_call_operand.hbm [shape: f32[1,32], index: 6, kind: output, shape index: {1}]  }
   0x1   :  { %14 = vsyncpa [#allocation8], 0 }
   0x2   :  { %15 = vsyncpa [#allocation6], 0 }
   0x3   :  { %16 = vsyncpa [#allocation11], 0  ;;  %s21_s23 = sshll.u32 %s394_s1, 4  ;;  %s323_s24 = smov [#allocation4]   ;;  %s22_s23 = int_to_ptr.hbm [resolvable:$true] %s21_s23 }
   0x4   :  { %s23_s25 = sshll.u32 %s323_s24, 4  ;;  %s36_s28 = sshll.u32 %s396_s3, 4  ;;  %s24_s25 = int_to_ptr.vmem [resolvable:$true] %s23_s25  ;;  %s37_s28 = int_to_ptr.hbm [resolvable:$true] %s36_s28 }
   0x5   :  { %s324_s29 = smov 128   ;;  %s325_s30 = smov 8  }
   0x6   :  { %29 = dma.hbm_to_vmem [thread:$0]  %s22_s23, 256, %s24_s25, [#allocation5], %s324_s29, %s324_s29, %s325_s30  }
   0x7   :  { %s326_s7 = smov [#allocation7]  }
   0x8   :  { %s38_s8 = sshll.u32 %s326_s7, 4  ;;  %s39_s8 = int_to_ptr.vmem [resolvable:$true] %s38_s8 }
   0x9   :  { %44 = dma.hbm_to_vmem [thread:$0]  %s37_s28, 1024, %s39_s8, [#allocation8], %s324_s29, %s324_s29, %s325_s30  }
   0xa   :  { %315 = dma.done.wait [#allocation5], 256  }
   0xb   :  { %316 = vsyncadd [#allocation5], 4294967040 }
   0xc   :  { %317 = dma.done.wait [#allocation8], 1024  }
   0xd   :  { %318 = vsyncadd [#allocation8], 4294966272  ;;  %v62_v0 = vld [vmem:[#allocation7 + $0x38] sm:$0xff]  ;;  %v61_v2 = vld [vmem:[#allocation7 + $0x30] sm:$0xff]  ;;  %vm68_vm0 = vcmask 261120   ;;  %s66_s11 = scalar_lea.vmem [#allocation4], %s393_s0 }
   0xe   :  { %v58_v1 = vld [vmem:[#allocation7 + $0x18] sm:$0xff]  ;;  %84 = vmatpush.msra.mxu0 %v62_v0  ;;  %v57_v3 = vld [vmem:[#allocation7 + $0x10] sm:$0xff]  ;;  %v60_v4 = vld [vmem:[#allocation7 + $0x28] sm:$0xff]  ;;  %s327_s14 = smov 32   ;;  %s328_s0 = smov 64   ;;  %vm162_vm5 = vcmask 253952  }
   0xf   :  { %107 = vmatpush.msra.mxu1 %v58_v1  ;;  %v56_v5 = vld [vmem:[#allocation7 + $0x8] sm:$0xff]  ;;  %v59_v6 = vld [vmem:[#allocation7 + $0x20] sm:$0xff]  ;;  %v64_v8 = vld [vmem:[%s395_s2] sm:$0x1]  ;;  %s330_s17 = smov [#allocation9]   ;;  %s172_s21 = sshll.u32 %s398_s5, 4  ;;  %s173_s21 = int_to_ptr.hbm [resolvable:$true] %s172_s21 }
  0x10   :  { %85 = vmatpush.msra.mxu0 %v61_v2  ;;  %v55_v7 = vld [vmem:[#allocation7] sm:$0xff]  ;;  %v67_v9 = vld [vmem:[%s66_s11] sm:$0x1]  ;;  %s170_s18 = sshll.u32 %s330_s17, 4  ;;  %s331_s22 = smov [#allocation10]   ;;  %s171_s18 = int_to_ptr.vmem [resolvable:$true] %s170_s18 }
  0x11   :  { %108 = vmatpush.msra.mxu1 %v57_v3  ;;  %v63_v11 = vld [vmem:[%s397_s4] sm:$0x1]  ;;  %s329_s4 = smov 96   ;;  %s181_s23 = sshll.u32 %s331_s22, 4  ;;  %s182_s23 = int_to_ptr.vmem [resolvable:$true] %s181_s23 }
  0x12   :  { %86 = vmatpush.msra.mxu0 %v60_v4  ;;  %v212_v33 = vld [vmem:[%s395_s2] ss:$0 sm:$0xff]  ;;  %s183_s2 = sshll.u32 %s399_s6, 4  ;;  %s184_s2 = int_to_ptr.hbm [resolvable:$true] %s183_s2 }
  0x13   :  { %109 = vmatpush.msra.mxu1 %v56_v5 }
  0x14   :  { %87 = vmatpush.msra.mxu0 %v59_v6 }
  0x15   :  { %110 = vmatpush.msra.mxu1 %v55_v7  ;;  %200 = vmatmul.msk.f32.vlgmr.msra.gmra.mxu0 %vm68_vm0, %v64_v8 }
  0x16   :  { %201 = vmatmul.msk.f32.vlgmr.msra.gmra.mxu1 %vm68_vm0, %v67_v9 }
  0x92   :  { %v89_v10 = vpop.f32.mrf.mxu0 }
  0x93   :  { %v112_v12 = vpop.f32.mrf.mxu1 }
  0x94   :  { %v113_v13 = vadd.f32 %v112_v12, %v89_v10 }
  0x96   :  { %v115_v14 = vadd.f32 %v113_v13, %v63_v11 }
  0x98   :  { %136 = vrot.lane.b32.xlu0 %v115_v14, %s327_s14  ;;  %v202_v15 = vmul.f32 -1.442695, %v115_v14 }
  0x9a   :  { %213 = vpow2.f32 %v202_v15 }
  0xa0   :  { %v214_v16 = vpop.eup %213 }
  0xa1   :  { %v119_v17 = vadd.f32 1.0, %v214_v16 }
  0xa3   :  { %215 = vrcp.f32 %v119_v17  ;;  %v131_v23 = vand.u32 2147483648, %v119_v17  ;;  %vm125_vm2 = vweird.f32 %v119_v17  ;;  %v129_v24 = vand.u32 2147483647, %v119_v17 }
  0xa5   :  { %v132_v26 = vor.u32 1.1754944e-38, %v131_v23  ;;  %vm130_vm4 = vcmp.eq.f32.partialorder %v129_v24, 8.507059e+37 }
  0xa9   :  { %v216_v18 = vpop.eup %215 }
  0xaa   :  { %v121_v19 = vmul.f32 %v216_v18, %v119_v17  ;;  %vm126_vm1 = vweird.f32 %v216_v18 }
  0xab   :  { %vm127_vm3 = vmor %vm125_vm2, %vm126_vm1 }
  0xac   :  { %v122_v20 = vsub.f32 1.0, %v121_v19 }
  0xae   :  { %v123_v21 = vmul.f32 %v216_v18, %v122_v20 }
  0xb0   :  { %v124_v22 = vadd.f32 %v216_v18, %v123_v21 }
  0xb2   :  { %v128_v25 = vsel %vm127_vm3, %v216_v18, %v124_v22 }
  0xb3   :  { %v133_v28 = vsel %vm130_vm4, %v132_v26, %v128_v25 }
  0xb4   :  { %v146_v35 = vsub.f32 1.0, %v133_v28 }
 0x10a   :  { %v137_v27 = vpop.permute.xlu0 %136 }
 0x10b   :  { %v139_v29 = vmul.f32 %v137_v27, %v133_v28 }
 0x10d   :  { %141 = vrot.lane.b32.xlu0 %v139_v29, %s328_s0 }
 0x17f   :  { %v142_v30 = vpop.permute.xlu0 %141 }
 0x180   :  { %v144_v31 = vadd.f32 %v142_v30, %v115_v14 }
 0x182   :  { %217 = vtanh.f32 %v144_v31 }
 0x188   :  { %v218_v32 = vpop.eup %217 }
 0x189   :  { %148 = vrot.lane.b32.xlu1 %v218_v32, %s329_s4 }
 0x191   :  { %153 = vrot.lane.b32.xlu1 %v212_v33, %s327_s14 }
 0x1fb   :  { %v149_v34 = vpop.permute.xlu1 %148 }
 0x1fc   :  { %v151_v37 = vmul.f32 %v149_v34, %v146_v35 }
 0x203   :  { %v154_v36 = vpop.permute.xlu1 %153 }
 0x204   :  { %v156_v38 = vmul.f32 %v154_v36, %v133_v28 }
 0x206   :  { %v157_v39 = vadd.f32 %v156_v38, %v151_v37 }
 0x208   :  { %159 = vrot.lane.b32.xlu2 %v157_v39, %s329_s4 }
 0x262   :  { %v160_v40 = vpop.permute.xlu2 %159 }
 0x263   :  { %163 = vst.msk [vmem:[#allocation9] sm:$0x1] %vm162_vm5, %v160_v40 }
 0x264   :  { %164 = vst.msk [vmem:[#allocation10] sm:$0x1] %vm162_vm5, %v160_v40  ;;  %175 = dma.vmem_to_hbm [thread:$0]  %s171_s18, 16, %s173_s21, [#allocation6]  }
 0x265   :  { %186 = dma.vmem_to_hbm [thread:$0]  %s182_s23, 16, %s184_s2, [#allocation11]  }
 0x266   :  { %319 = dma.done.wait [#allocation6], 16  }
 0x267   :  { %320 = vsyncadd [#allocation6], 4294967280 }
 0x268   :  { %321 = dma.done.wait [#allocation11], 16  }
 0x269   :  { %322 = vsyncadd [#allocation11], 4294967280 }
 0x26a   :  { %195 = vsyncpa [#allocation5], 1 }
 0x26b   :  { %196 = vsyncpa [#allocation8], 1 }
 0x26c   :  { %197 = vsyncpa [#allocation6], 1 }
 0x26d   :  { %198 = vsyncpa [#allocation11], 1 }

</bundles_post_ra>
